<compile_context>
chip_gen: v6e
topology: v6e:2x2x1
jax: 0.10.0
libtpu: 0.0.40
codegen_flags: <defaults>
</compile_context>

<pallas_src>
import functools

import jax
import jax.numpy as jnp
from jax import lax
from jax.experimental import pallas as pl
from jax.experimental.pallas import tpu as pltpu


def _dwconv_kernel(tap_ref, x_ref, o_ref, *, KH, KW, C, Ho1, TH):
    # tap_ref: VMEM (KH*KW, Wo1*C) f32 -- per-channel taps tiled along the lane axis.
    # x_ref  : VMEM (bn, Hp, Wp*C)     -- padded, channel-interleaved-width input.
    # o_ref  : VMEM (bn, Ho1, Wo1*C)   -- stride-1 output block.
    bn = x_ref.shape[0]
    WoC = o_ref.shape[2]

    def rows(b, r0, th):
        # One output row tile: (th, Wo1*C) f32 accumulator (kept small -> no spills).
        acc = jnp.zeros((th, WoC), jnp.float32)
        for kh in range(KH):
            for kw in range(KW):
                # Contiguous, static lane slice; dynamic sublane start only.
                win = x_ref[b, pl.ds(r0 + kh, th), pl.ds(kw * C, WoC)]
                acc = acc + win.astype(jnp.float32) * tap_ref[kh * KW + kw, :]
        o_ref[b, pl.ds(r0, th), :] = acc.astype(o_ref.dtype)

    n_full = Ho1 // TH
    rem = Ho1 - n_full * TH

    def batch_body(b, carry):
        if n_full > 0:
            def row_body(rt, c2):
                r0 = rt * TH
                if TH % 8 == 0:
                    r0 = pl.multiple_of(r0, 8)      # sublane-aligned row-tile starts
                rows(b, r0, TH)
                return c2
            lax.fori_loop(0, n_full, row_body, 0)
        if rem > 0:
            rows(b, n_full * TH, rem)               # static ragged tail
        return carry

    lax.fori_loop(0, bn, batch_body, 0)


def fixed_depthwise_conv2d(x, kernel, stride: int = 1, padding: int = 0):
    """Depthwise conv2d matching F.conv2d(x, kernel, stride, padding, groups=C).

    x:      (N, C, H, W)   NCHW (PyTorch convention)
    kernel: (C, 1, KH, KW) fixed per-channel taps
    returns (N, C, Ho, Wo)
    """
    N, C, H, W = x.shape
    assert kernel.ndim == 4 and kernel.shape[0] == C and kernel.shape[1] == 1
    KH, KW = int(kernel.shape[2]), int(kernel.shape[3])
    assert stride >= 1 and padding >= 0

    Hp, Wp = H + 2 * padding, W + 2 * padding
    Ho1, Wo1 = Hp - KH + 1, Wp - KW + 1              # stride-1 output extent
    assert Ho1 >= 1 and Wo1 >= 1, "kernel larger than padded input"
    Ho = (Hp - KH) // stride + 1
    Wo = (Wp - KW) // stride + 1

    elt = jnp.dtype(x.dtype).itemsize
    WpC, WoC = Wp * C, Wo1 * C

    # --- single wrapper-side re-layout: NCHW -> padded channel-interleaved width.
    xp = jnp.transpose(x, (0, 2, 3, 1))                                   # (N,H,W,C)
    if padding > 0:
        xp = jnp.pad(xp, ((0, 0), (padding, padding), (padding, padding), (0, 0)))
    xp = xp.reshape(N, Hp, WpC)                                           # (N,Hp,Wp*C)

    # --- taps tiled along the lane axis: tap_rows[t, w*C + c] = kernel[c,0,kh,kw].
    taps = kernel.reshape(C, KH * KW).T.astype(jnp.float32)               # (KH*KW, C)
    tap_rows = jnp.tile(taps, (1, Wo1))                                   # (KH*KW, Wo1*C)

    # --- per-chip block sizing (v7x: 64 MiB VMEM, v5e/v6e: 128 MiB).
    try:
        vmem_cap = int(pltpu.get_tpu_info().vmem_capacity_bytes)
    except Exception:
        vmem_cap = 64 << 20
    if vmem_cap <= 0:
        vmem_cap = 64 << 20
    block_budget = int(vmem_cap * 0.4)               # double-buffered blocks live here
    per_b_bytes = (Hp * WpC + Ho1 * WoC) * elt       # in + out bytes per batch element
    bn_cap = max(1, min(block_budget // max(1, 2 * per_b_bytes),
                        (2 << 20) // max(1, per_b_bytes)))   # ~<=2 MiB per grid step
    if N >= 2:
        bn_cap = min(bn_cap, N // 2)   # keep >=2 parallel steps (v7x has 2 TensorCores)
    bn = 1
    for d in range(1, N + 1):          # largest divisor of N within the cap
        if N % d == 0 and d <= bn_cap:
            bn = d

    # --- accumulator row tile: keep the live f32 acc around ~16 vregs.
    th_raw = max(1, (64 * 1024) // max(1, WoC * 4))
    if th_raw >= Ho1:
        TH = Ho1
    elif th_raw >= 8:
        TH = (th_raw // 8) * 8
    else:
        TH = th_raw

    kern = functools.partial(_dwconv_kernel, KH=KH, KW=KW, C=C, Ho1=Ho1, TH=TH)

    in_block = bn * Hp * WpC * elt
    out_block = bn * Ho1 * WoC * elt
    need = 2 * (in_block + out_block) + tap_rows.size * 4 + (2 << 20)
    vmem_limit = int(min(max(need, 8 << 20), int(vmem_cap * 0.85)))

    cost = pl.CostEstimate(
        flops=2 * N * C * Ho1 * Wo1 * KH * KW,
        transcendentals=0,
        bytes_accessed=int((N * Hp * WpC + N * Ho1 * WoC) * elt + tap_rows.size * 4),
    )

    out = pl.pallas_call(
        kern,
        out_shape=jax.ShapeDtypeStruct((N, Ho1, WoC), x.dtype),
        grid=(N // bn,),
        in_specs=[
            pl.BlockSpec((KH * KW, WoC), lambda b: (0, 0)),     # tap rows (stay resident)
            pl.BlockSpec((bn, Hp, WpC), lambda b: (b, 0, 0)),   # padded input batch group
        ],
        out_specs=pl.BlockSpec((bn, Ho1, WoC), lambda b: (b, 0, 0)),
        compiler_params=pltpu.CompilerParams(
            dimension_semantics=("parallel",),
            vmem_limit_bytes=vmem_limit,
        ),
        cost_estimate=cost,
    )(tap_rows, xp)

    # --- undo the layout: (N, Ho1, Wo1*C) -> NCHW; decimate for stride > 1.
    out = out.reshape(N, Ho1, Wo1, C).transpose(0, 3, 1, 2)
    if stride > 1:
        out = out[:, :, ::stride, ::stride][:, :, :Ho, :Wo]
    return out


def _reference_depthwise_conv2d(x, kernel, stride, padding):
    # Pure-JAX reference (lax conv with feature_group_count = C).
    C = x.shape[1]
    return lax.conv_general_dilated(
        x,
        kernel,
        window_strides=(stride, stride),
        padding=((padding, padding), (padding, padding)),
        dimension_numbers=("NCHW", "OIHW", "NCHW"),
        feature_group_count=C,
    )


if __name__ == "__main__":
    key = jax.random.PRNGKey(0)
    kx, kk = jax.random.split(key)

    N, C, H, W = 2, 4, 16, 16
    KH = KW = 3

    x = jax.random.normal(kx, (N, C, H, W), dtype=jnp.float32)
    # Deterministic fixed kernel (as passed to FixedDepthwiseConv2d.__init__).
    fixed_kernel = jax.random.normal(kk, (C, 1, KH, KW), dtype=jnp.float32)

    # Main case: stride=1, padding=1 (typical NCA perception conv).
    out = jax.block_until_ready(fixed_depthwise_conv2d(x, fixed_kernel, stride=1, padding=1))
    ref = _reference_depthwise_conv2d(x, fixed_kernel, 1, 1)
    assert out.shape == ref.shape, (out.shape, ref.shape)
    assert jnp.allclose(out, ref, atol=1e-5, rtol=1e-5), "mismatch vs lax reference (pad=1)"

    # padding=0 path (different Ho1/Wo1, ragged row tile).
    out0 = jax.block_until_ready(fixed_depthwise_conv2d(x, fixed_kernel, stride=1, padding=0))
    ref0 = _reference_depthwise_conv2d(x, fixed_kernel, 1, 0)
    assert out0.shape == ref0.shape, (out0.shape, ref0.shape)
    assert jnp.allclose(out0, ref0, atol=1e-5, rtol=1e-5), "mismatch vs lax reference (pad=0)"

    # stride=2 path (stride-1 kernel output + wrapper decimation).
    out2 = jax.block_until_ready(fixed_depthwise_conv2d(x, fixed_kernel, stride=2, padding=1))
    ref2 = _reference_depthwise_conv2d(x, fixed_kernel, 2, 1)
    assert out2.shape == ref2.shape, (out2.shape, ref2.shape)
    assert jnp.allclose(out2, ref2, atol=1e-5, rtol=1e-5), "mismatch vs lax reference (stride=2)"

    print("KERNEL_OK")
</pallas_src>

<mosaic_0001>
module attributes {stable_mosaic.version = 11 : i64} {
  func.func @_dwconv_kernel(%arg0: i32, %arg1: memref<9x64xf32, #tpu.memory_space<vmem>>, %arg2: memref<1x18x72xf32, #tpu.memory_space<vmem>>, %arg3: memref<1x16x64xf32, #tpu.memory_space<vmem>>) attributes {dimension_semantics = [#tpu.dimension_semantics<parallel>], iteration_bounds = array<i64: 2>, scalar_prefetch = 0 : i64, scratch_operands = 0 : i64, tpu.core_type = #tpu.core_type<tc>, window_params = [{pipeline_mode = #tpu.pipeline_mode<synchronous>, transform_indices = @transform_0, window_bounds = array<i64: 9, 64>}, {transform_indices = @transform_1, window_bounds = array<i64: 1, 18, 72>}, {transform_indices = @transform_2, window_bounds = array<i64: 1, 16, 64>}]} {
    %c0_i32 = arith.constant 0 : i32
    %c0_i32_0 = arith.constant 0 : i32
    %c16_i32 = arith.constant 16 : i32
    %0 = arith.muli %c0_i32_0, %c16_i32 : i32
    %1 = tpu.assume_multiple %0, 8 : i32
    %cst = arith.constant 0.000000e+00 : f32
    %2 = vector.broadcast %cst : f32 to vector<16x64xf32>
    %c0_i32_1 = arith.constant 0 : i32
    %3 = arith.addi %1, %c0_i32_1 : i32
    %4 = arith.index_cast %c0_i32 : i32 to index
    %5 = arith.index_cast %3 : i32 to index
    %c0 = arith.constant 0 : index
    %6 = vector.load %arg2[%4, %5, %c0] : memref<1x18x72xf32, #tpu.memory_space<vmem>>, vector<1x16x64xf32>
    %7 = vector.shape_cast %6 : vector<1x16x64xf32> to vector<16x64xf32>
    %c0_2 = arith.constant 0 : index
    %c0_3 = arith.constant 0 : index
    %8 = vector.load %arg1[%c0_2, %c0_3] : memref<9x64xf32, #tpu.memory_space<vmem>>, vector<1x64xf32>
    %9 = vector.shape_cast %8 : vector<1x64xf32> to vector<64xf32>
    %10 = vector.shape_cast %9 : vector<64xf32> to vector<1x64xf32>
    %11 = vector.broadcast %10 : vector<1x64xf32> to vector<16x64xf32>
    %12 = arith.mulf %7, %11 : vector<16x64xf32>
    %13 = arith.addf %2, %12 : vector<16x64xf32>
    %c0_i32_4 = arith.constant 0 : i32
    %14 = arith.addi %1, %c0_i32_4 : i32
    %15 = arith.index_cast %c0_i32 : i32 to index
    %16 = arith.index_cast %14 : i32 to index
    %c4 = arith.constant 4 : index
    %17 = vector.load %arg2[%15, %16, %c4] : memref<1x18x72xf32, #tpu.memory_space<vmem>>, vector<1x16x64xf32>
    %18 = vector.shape_cast %17 : vector<1x16x64xf32> to vector<16x64xf32>
    %c1 = arith.constant 1 : index
    %c0_5 = arith.constant 0 : index
    %19 = vector.load %arg1[%c1, %c0_5] : memref<9x64xf32, #tpu.memory_space<vmem>>, vector<1x64xf32>
    %20 = vector.shape_cast %19 : vector<1x64xf32> to vector<64xf32>
    %21 = vector.shape_cast %20 : vector<64xf32> to vector<1x64xf32>
    %22 = vector.broadcast %21 : vector<1x64xf32> to vector<16x64xf32>
    %23 = arith.mulf %18, %22 : vector<16x64xf32>
    %24 = arith.addf %13, %23 : vector<16x64xf32>
    %c0_i32_6 = arith.constant 0 : i32
    %25 = arith.addi %1, %c0_i32_6 : i32
    %26 = arith.index_cast %c0_i32 : i32 to index
    %27 = arith.index_cast %25 : i32 to index
    %c8 = arith.constant 8 : index
    %28 = vector.load %arg2[%26, %27, %c8] : memref<1x18x72xf32, #tpu.memory_space<vmem>>, vector<1x16x64xf32>
    %29 = vector.shape_cast %28 : vector<1x16x64xf32> to vector<16x64xf32>
    %c2 = arith.constant 2 : index
    %c0_7 = arith.constant 0 : index
    %30 = vector.load %arg1[%c2, %c0_7] : memref<9x64xf32, #tpu.memory_space<vmem>>, vector<1x64xf32>
    %31 = vector.shape_cast %30 : vector<1x64xf32> to vector<64xf32>
    %32 = vector.shape_cast %31 : vector<64xf32> to vector<1x64xf32>
    %33 = vector.broadcast %32 : vector<1x64xf32> to vector<16x64xf32>
    %34 = arith.mulf %29, %33 : vector<16x64xf32>
    %35 = arith.addf %24, %34 : vector<16x64xf32>
    %c1_i32 = arith.constant 1 : i32
    %36 = arith.addi %1, %c1_i32 : i32
    %37 = arith.index_cast %c0_i32 : i32 to index
    %38 = arith.index_cast %36 : i32 to index
    %c0_8 = arith.constant 0 : index
    %39 = vector.load %arg2[%37, %38, %c0_8] : memref<1x18x72xf32, #tpu.memory_space<vmem>>, vector<1x16x64xf32>
    %40 = vector.shape_cast %39 : vector<1x16x64xf32> to vector<16x64xf32>
    %c3 = arith.constant 3 : index
    %c0_9 = arith.constant 0 : index
    %41 = vector.load %arg1[%c3, %c0_9] : memref<9x64xf32, #tpu.memory_space<vmem>>, vector<1x64xf32>
    %42 = vector.shape_cast %41 : vector<1x64xf32> to vector<64xf32>
    %43 = vector.shape_cast %42 : vector<64xf32> to vector<1x64xf32>
    %44 = vector.broadcast %43 : vector<1x64xf32> to vector<16x64xf32>
    %45 = arith.mulf %40, %44 : vector<16x64xf32>
    %46 = arith.addf %35, %45 : vector<16x64xf32>
    %c1_i32_10 = arith.constant 1 : i32
    %47 = arith.addi %1, %c1_i32_10 : i32
    %48 = arith.index_cast %c0_i32 : i32 to index
    %49 = arith.index_cast %47 : i32 to index
    %c4_11 = arith.constant 4 : index
    %50 = vector.load %arg2[%48, %49, %c4_11] : memref<1x18x72xf32, #tpu.memory_space<vmem>>, vector<1x16x64xf32>
    %51 = vector.shape_cast %50 : vector<1x16x64xf32> to vector<16x64xf32>
    %c4_12 = arith.constant 4 : index
    %c0_13 = arith.constant 0 : index
    %52 = vector.load %arg1[%c4_12, %c0_13] : memref<9x64xf32, #tpu.memory_space<vmem>>, vector<1x64xf32>
    %53 = vector.shape_cast %52 : vector<1x64xf32> to vector<64xf32>
    %54 = vector.shape_cast %53 : vector<64xf32> to vector<1x64xf32>
    %55 = vector.broadcast %54 : vector<1x64xf32> to vector<16x64xf32>
    %56 = arith.mulf %51, %55 : vector<16x64xf32>
    %57 = arith.addf %46, %56 : vector<16x64xf32>
    %c1_i32_14 = arith.constant 1 : i32
    %58 = arith.addi %1, %c1_i32_14 : i32
    %59 = arith.index_cast %c0_i32 : i32 to index
    %60 = arith.index_cast %58 : i32 to index
    %c8_15 = arith.constant 8 : index
    %61 = vector.load %arg2[%59, %60, %c8_15] : memref<1x18x72xf32, #tpu.memory_space<vmem>>, vector<1x16x64xf32>
    %62 = vector.shape_cast %61 : vector<1x16x64xf32> to vector<16x64xf32>
    %c5 = arith.constant 5 : index
    %c0_16 = arith.constant 0 : index
    %63 = vector.load %arg1[%c5, %c0_16] : memref<9x64xf32, #tpu.memory_space<vmem>>, vector<1x64xf32>
    %64 = vector.shape_cast %63 : vector<1x64xf32> to vector<64xf32>
    %65 = vector.shape_cast %64 : vector<64xf32> to vector<1x64xf32>
    %66 = vector.broadcast %65 : vector<1x64xf32> to vector<16x64xf32>
    %67 = arith.mulf %62, %66 : vector<16x64xf32>
    %68 = arith.addf %57, %67 : vector<16x64xf32>
    %c2_i32 = arith.constant 2 : i32
    %69 = arith.addi %1, %c2_i32 : i32
    %70 = arith.index_cast %c0_i32 : i32 to index
    %71 = arith.index_cast %69 : i32 to index
    %c0_17 = arith.constant 0 : index
    %72 = vector.load %arg2[%70, %71, %c0_17] : memref<1x18x72xf32, #tpu.memory_space<vmem>>, vector<1x16x64xf32>
    %73 = vector.shape_cast %72 : vector<1x16x64xf32> to vector<16x64xf32>
    %c6 = arith.constant 6 : index
    %c0_18 = arith.constant 0 : index
    %74 = vector.load %arg1[%c6, %c0_18] : memref<9x64xf32, #tpu.memory_space<vmem>>, vector<1x64xf32>
    %75 = vector.shape_cast %74 : vector<1x64xf32> to vector<64xf32>
    %76 = vector.shape_cast %75 : vector<64xf32> to vector<1x64xf32>
    %77 = vector.broadcast %76 : vector<1x64xf32> to vector<16x64xf32>
    %78 = arith.mulf %73, %77 : vector<16x64xf32>
    %79 = arith.addf %68, %78 : vector<16x64xf32>
    %c2_i32_19 = arith.constant 2 : i32
    %80 = arith.addi %1, %c2_i32_19 : i32
    %81 = arith.index_cast %c0_i32 : i32 to index
    %82 = arith.index_cast %80 : i32 to index
    %c4_20 = arith.constant 4 : index
    %83 = vector.load %arg2[%81, %82, %c4_20] : memref<1x18x72xf32, #tpu.memory_space<vmem>>, vector<1x16x64xf32>
    %84 = vector.shape_cast %83 : vector<1x16x64xf32> to vector<16x64xf32>
    %c7 = arith.constant 7 : index
    %c0_21 = arith.constant 0 : index
    %85 = vector.load %arg1[%c7, %c0_21] : memref<9x64xf32, #tpu.memory_space<vmem>>, vector<1x64xf32>
    %86 = vector.shape_cast %85 : vector<1x64xf32> to vector<64xf32>
    %87 = vector.shape_cast %86 : vector<64xf32> to vector<1x64xf32>
    %88 = vector.broadcast %87 : vector<1x64xf32> to vector<16x64xf32>
    %89 = arith.mulf %84, %88 : vector<16x64xf32>
    %90 = arith.addf %79, %89 : vector<16x64xf32>
    %c2_i32_22 = arith.constant 2 : i32
    %91 = arith.addi %1, %c2_i32_22 : i32
    %92 = arith.index_cast %c0_i32 : i32 to index
    %93 = arith.index_cast %91 : i32 to index
    %c8_23 = arith.constant 8 : index
    %94 = vector.load %arg2[%92, %93, %c8_23] : memref<1x18x72xf32, #tpu.memory_space<vmem>>, vector<1x16x64xf32>
    %95 = vector.shape_cast %94 : vector<1x16x64xf32> to vector<16x64xf32>
    %c8_24 = arith.constant 8 : index
    %c0_25 = arith.constant 0 : index
    %96 = vector.load %arg1[%c8_24, %c0_25] : memref<9x64xf32, #tpu.memory_space<vmem>>, vector<1x64xf32>
    %97 = vector.shape_cast %96 : vector<1x64xf32> to vector<64xf32>
    %98 = vector.shape_cast %97 : vector<64xf32> to vector<1x64xf32>
    %99 = vector.broadcast %98 : vector<1x64xf32> to vector<16x64xf32>
    %100 = arith.mulf %95, %99 : vector<16x64xf32>
    %101 = arith.addf %90, %100 : vector<16x64xf32>
    %102 = arith.index_cast %c0_i32 : i32 to index
    %103 = arith.index_cast %1 : i32 to index
    %c0_26 = arith.constant 0 : index
    %104 = vector.load %arg3[%102, %103, %c0_26] : memref<1x16x64xf32, #tpu.memory_space<vmem>>, vector<1x16x64xf32>
    %105 = vector.shape_cast %104 : vector<1x16x64xf32> to vector<16x64xf32>
    %106 = vector.shape_cast %101 : vector<16x64xf32> to vector<1x16x64xf32>
    tpu.vector_store %arg3[%102, %103, %c0_26], %106 {strides = array<i32>} : memref<1x16x64xf32, #tpu.memory_space<vmem>>, vector<1x16x64xf32>,
    %c1_i32_27 = arith.constant 1 : i32
    %c1_i32_28 = arith.constant 1 : i32
    return
  }
  func.func @transform_0(%arg0: i32) -> (i32, i32) {
    %c0_i32 = arith.constant 0 : i32
    %c0_i32_0 = arith.constant 0 : i32
    %c0_i32_1 = arith.constant 0 : i32
    return %c0_i32, %c0_i32_0 : i32, i32
  }
  func.func @transform_1(%arg0: i32) -> (i32, i32, i32) {
    %c0_i32 = arith.constant 0 : i32
    %c0_i32_0 = arith.constant 0 : i32
    %c0_i32_1 = arith.constant 0 : i32
    return %arg0, %c0_i32, %c0_i32_0 : i32, i32, i32
  }
  func.func @transform_2(%arg0: i32) -> (i32, i32, i32) {
    %c0_i32 = arith.constant 0 : i32
    %c0_i32_0 = arith.constant 0 : i32
    %c0_i32_1 = arith.constant 0 : i32
    return %arg0, %c0_i32, %c0_i32_0 : i32, i32, i32
  }
}

</mosaic_0001>

<bundles_post_ra>
// kernel: tpu_custom_call.1
= control target key start
LH: loop header
LB: loop body
LE: loop exit
PB: predicated region body
PF: predicated region fallthrough
CT: control target
= control target key end

     0   :  { %7 = vsyncpa [#allocation3], 0  ;;  %s672_s0 = inlined_call_operand.vmem [shape: f32[9,64], index: 0, kind: input, shape index: {}]   ;;  %s673_s1 = inlined_call_operand.vmem [shape: f32[2,18,72], index: 1, kind: input, shape index: {}]   ;;  %s674_s2 = inlined_call_operand.hbm [shape: f32[2,16,64], index: 2, kind: output, shape index: {}]  }
   0x1   :  { %9 = vsyncpa [#allocation3 + $0x1], 0  ;;  %s539_s9 = smov 0   ;;  %s541_s10 = smov 0  }
   0x2   :  { %s543_s11 = smov 0   ;;  %s545_s12 = smov 0  }
   0x3 LB: > { %s560_s13 = sadd.s32 4294967295, %s516_s12   ;;  %s386_s14 = sadd.s32 4294967294, %s516_s12   ;;  %s516_s12 = sphi %s545_s12, %s680_s12   ;;  %s512_s11 = sphi %s543_s11, %s679_s11   ;;  %s508_s10 = sphi %s541_s10, %s678_s10   ;;  %s504_s9 = sphi %s539_s9, %s677_s9  }
   0x4   : > { %s564_s15 = sadd.s32 1, %s516_s12   ;;  %s69_s16 = sadd.s32 1, %s512_s11 }
   0x5   : > { %s66_s17 = ssub.s32 %s516_s12, %s564_s15  ;;  %p79_p0 = scmp.ne.s32.totalorder %s512_s11, %s508_s10 }
   0x6   : > { %p67_p1 = scmp.eq.s32.totalorder %s66_s17, 0  ;;  %p80_p2 = scmp.eq.s32.totalorder %s560_s13, 1 }
   0x7   : > { %p85_p3 = scmp.ne.s32.totalorder %s508_s10, %s504_s9  ;;  %p86_p4 = scmp.eq.s32.totalorder %s386_s14, 1 }
   0x8   : > { %s575_s18 = scalar_select %p67_p1, %s512_s11, %s69_s16  }
   0x9   : > { %p577_p5 = por %p80_p2, %p79_p0  ;;  %p581_p6 = por %p86_p4, %p85_p3 }
   0xa   : > { %p389_p7 = scmp.ge.s32.totalorder %s516_s12, 1  ;;  %p115_p8 = scmp.lt.s32.totalorder %s516_s12, 3 }
   0xc   : > { %p116_p9 = pnand %p389_p7, %p115_p8 }
   0xd   : > { %s518_s23 = smov (!%p116_p9), 4   ;;  %s519_s30 = smov (!%p116_p9), 8  }
   0xe   : > { %119 = sbr.rel (%p116_p9) target bundleno = 288 (0x120), region = 28  ;;  %p137_p10 = scmp.lt.s32.totalorder (!%p116_p9), %s560_s13, 1 }
   0xf   : > { %s520_s21 = smov (!%p116_p9), 124   ;;  %s521_s22 = smov (!%p116_p9), 120  }
  0x10   : > { %s134_s29 = sand.u32 (!%p116_p9), 1, %s508_s10   ;;  %s410_s6 = sshll.u32 (!%p116_p9), %s560_s13, 8 }
  0x11   : > { %s390_s3 = sshll.u32 (!%p116_p9), %s134_s29, 4  ;;  %s629_s14 = scalar_lea.hbm (!%p116_p9), %s674_s2, %s410_s6 }
  0x12   : > { %s136_s4 = scalar_lea.vmem (!%p116_p9), [#allocation2], %s390_s3 }
  0x13   : > { %v393_v0 = vld [vmem:[%s672_s0 + $0x1] ss:$0 sm:$0xff]  ;;  %v398_v1 = vld [vmem:[%s672_s0 + $0x4] ss:$0 sm:$0xff]  ;;  %v394_v2 = vld [vmem:[%s672_s0 + $0x2] ss:$0 sm:$0xff] }
  0x14   : > { %159 = vrot.lane.b32.xlu0 %v393_v0, %s518_s23  ;;  %214 = vrot.lane.b32.xlu1 %v398_v1, %s518_s23  ;;  %v399_v3 = vld [vmem:[%s672_s0 + $0x5] ss:$0 sm:$0xff]  ;;  %v403_v4 = vld [vmem:[%s672_s0 + $0x7] ss:$0 sm:$0xff]  ;;  %s138_s7 = scalar_select %p137_p10, %s560_s13, 1  ;;  %vm305_vm0 = vcmask 523264  }
  0x15   : > { %v404_v5 = vld [vmem:[%s672_s0 + $0x8] ss:$0 sm:$0xff]  ;;  %v392_v30 = vld [vmem:[%s672_s0] ss:$0 sm:$0xff]  ;;  %v397_v35 = vld [vmem:[%s672_s0 + $0x3] ss:$0 sm:$0xff] }
  0x16   : > { %s411_s8 = smul.u32 24, %s138_s7  ;;  %v402_v48 = vld [vmem:[%s672_s0 + $0x6] ss:$0 sm:$0xff]  ;;  %s322_s5 = sshll.u32 %s136_s4, 4  ;;  %s624_s5 = int_to_ptr.vmem [resolvable:$true] %s322_s5 }
  0x17   : > { %s631_s13 = scalar_lea.sflag [#allocation3], %s134_s29  ;;  %s456_s16 = scalar_lea.vmem %s624_s5, 256 }
  0x18   : > { %180 = vrot.lane.b32.xlu0 %v394_v2, %s519_s30  ;;  %235 = vrot.lane.b32.xlu1 %v399_v3, %s519_s30  ;;  %s141_s17 = scalar_lea.vmem %s673_s1, %s411_s8  ;;  %p457_p11 = scmp.ne.s32.totalorder %s624_s5, %s456_s16 }
  0x19   : > { %v142_v6 = vld [vmem:[%s141_s17] sm:$0xff]  ;;  %v143_v7 = vld [vmem:[%s141_s17 + $0x8] sm:$0xff] }
  0x1a   : > { %v395_v13 = vld [vmem:[%s141_s17 + $0x1] sm:$0xff]  ;;  %v396_v14 = vld [vmem:[%s141_s17 + $0x9] sm:$0xff]  ;;  %v150_v31 = vmul.f32 %v392_v30, %v143_v7  ;;  %v149_v32 = vmul.f32 %v392_v30, %v142_v6  ;;  %p458_p12 = pnand %p457_p11, %p577_p5 }
  0x1b   : > { %v400_v23 = vld [vmem:[%s141_s17 + $0x2] sm:$0xff]  ;;  %v401_v24 = vld [vmem:[%s141_s17 + $0xa] sm:$0xff]  ;;  %v205_v38 = vmul.f32 %v397_v35, %v396_v14  ;;  %v204_v39 = vmul.f32 %v397_v35, %v395_v13  ;;  %s522_s17 = smov [#allocation2]  }
  0x1c   : > { %269 = vrot.lane.b32.xlu0 %v403_v4, %s518_s23  ;;  %290 = vrot.lane.b32.xlu1 %v404_v5, %s519_s30  ;;  %v260_v51 = vmul.f32 %v402_v48, %v401_v24  ;;  %v259_v52 = vmul.f32 %v402_v48, %v400_v23  ;;  %p459_p13 = pneg %p458_p12 }
  0x86   : > { %v160_v8 = vpop.permute.xlu0 %159  ;;  %v215_v11 = vpop.permute.xlu1 %214 }
  0x87   : > { %v162_v9 = vmul.f32 %v160_v8, %v142_v6  ;;  %v163_v10 = vmul.f32 %v160_v8, %v143_v7  ;;  %v217_v17 = vmul.f32 %v395_v13, %v215_v11  ;;  %v218_v18 = vmul.f32 %v396_v14, %v215_v11 }
  0x89   : > { %168 = vrot.lane.b32.xlu1 %v163_v10, %s520_s21  ;;  %166 = vrot.lane.b32.xlu0 %v162_v9, %s520_s21 }
  0x8a   : > { %v181_v12 = vpop.permute.xlu0 %180  ;;  %v236_v19 = vpop.permute.xlu1 %235 }
  0x8b   : > { %v183_v15 = vmul.f32 %v181_v12, %v142_v6  ;;  %v184_v16 = vmul.f32 %v181_v12, %v143_v7  ;;  %v238_v20 = vmul.f32 %v395_v13, %v236_v19  ;;  %v239_v21 = vmul.f32 %v396_v14, %v236_v19 }
  0x8d   : > { %189 = vrot.lane.b32.xlu1 %v184_v16, %s521_s22  ;;  %187 = vrot.lane.b32.xlu0 %v183_v15, %s521_s22 }
  0x8e   : > { %v270_v22 = vpop.permute.xlu0 %269  ;;  %v291_v27 = vpop.permute.xlu1 %290 }
  0x8f   : > { %v272_v25 = vmul.f32 %v400_v23, %v270_v22  ;;  %v273_v26 = vmul.f32 %v401_v24, %v270_v22  ;;  %v293_v28 = vmul.f32 %v400_v23, %v291_v27  ;;  %v294_v29 = vmul.f32 %v401_v24, %v291_v27 }
  0x91   : > { %223 = vrot.lane.b32.xlu1 %v218_v18, %s520_s21  ;;  %221 = vrot.lane.b32.xlu0 %v217_v17, %s520_s21 }
  0x95   : > { %244 = vrot.lane.b32.xlu1 %v239_v21, %s521_s22  ;;  %242 = vrot.lane.b32.xlu0 %v238_v20, %s521_s22 }
  0x99   : > { %278 = vrot.lane.b32.xlu1 %v273_v26, %s520_s21  ;;  %276 = vrot.lane.b32.xlu0 %v272_v25, %s520_s21  ;;  %s460_s21 = sshll.u32 %s522_s17, 4  ;;  %s461_s21 = int_to_ptr.vmem [resolvable:$false] %s460_s21 }
  0x9a   : > { %p463_p0 = scmp.lt.s32.totalorder %s624_s5, %s461_s21 }
  0x9d   : > { %299 = vrot.lane.b32.xlu1 %v294_v29, %s521_s22  ;;  %297 = vrot.lane.b32.xlu0 %v293_v28, %s521_s22  ;;  %s462_s22 = scalar_lea.vmem %s461_s21, 512 }
  0x9e   : > { %p464_p1 = scmp.lt.s32.totalorder %s462_s22, %s456_s16 }
  0xa0   : > { %p465_p2 = por %p464_p1, %p463_p0 }
  0xa2   : > { %p466_p3 = pnand %p465_p2, %p459_p13 }
  0xfb   : > { %v169_v33 = vpop.permute.xlu1 %168  ;;  %v167_v34 = vpop.permute.xlu0 %166 }
  0xfc   : > { %v173_v36 = vadd.f32 %v169_v33, %v150_v31  ;;  %v172_v37 = vadd.f32 %v167_v34, %v149_v32 }
  0xff   : > { %v190_v40 = vpop.permute.xlu1 %189  ;;  %v188_v41 = vpop.permute.xlu0 %187 }
 0x100   : > { %v194_v42 = vadd.f32 %v190_v40, %v173_v36  ;;  %v193_v43 = vadd.f32 %v188_v41, %v172_v37 }
 0x102   : > { %v207_v44 = vadd.f32 %v205_v38, %v194_v42  ;;  %v206_v45 = vadd.f32 %v204_v39, %v193_v43 }
 0x103   : > { %v224_v46 = vpop.permute.xlu1 %223  ;;  %v222_v47 = vpop.permute.xlu0 %221 }
 0x104   : > { %v228_v49 = vadd.f32 %v224_v46, %v207_v44  ;;  %v227_v50 = vadd.f32 %v222_v47, %v206_v45 }
 0x107   : > { %v245_v53 = vpop.permute.xlu1 %244  ;;  %v243_v54 = vpop.permute.xlu0 %242 }
 0x108   : > { %v249_v55 = vadd.f32 %v245_v53, %v228_v49  ;;  %v248_v56 = vadd.f32 %v243_v54, %v227_v50 }
 0x10a   : > { %v262_v57 = vadd.f32 %v260_v51, %v249_v55  ;;  %v261_v58 = vadd.f32 %v259_v52, %v248_v56 }
 0x10b   : > { %v279_v59 = vpop.permute.xlu1 %278  ;;  %v277_v60 = vpop.permute.xlu0 %276 }
 0x10c   : > { %v283_v61 = vadd.f32 %v279_v59, %v262_v57  ;;  %v282_v62 = vadd.f32 %v277_v60, %v261_v58 }
 0x10f   : > { %v300_v63 = vpop.permute.xlu1 %299  ;;  %v298_v0 = vpop.permute.xlu0 %297 }
 0x110   : > { %v304_v1 = vadd.f32 %v300_v63, %v283_v61  ;;  %v303_v2 = vadd.f32 %v298_v0, %v282_v62 }
 0x112   : > { %307 = vst.msk [vmem:[%s136_s4 + $0x8] sm:$0xff] %vm305_vm0, %v304_v1  ;;  %306 = vst.msk [vmem:[%s136_s4] sm:$0xff] %vm305_vm0, %v303_v2 }
 0x113   : > { %469 = shalt.err (!%p466_p3)
}
 0x114   : > { %s470_s23 = scalar_lea.hbm %s629_s14, 256  ;;  %s474_s26 = scalar_lea.hbm %s674_s2, 512 }
 0x115   : > { %p471_p4 = scmp.ne.s32.totalorder %s629_s14, %s470_s23  ;;  %p475_p9 = scmp.lt.s32.totalorder %s629_s14, %s674_s2 }
 0x116   : > { %p476_p10 = scmp.lt.s32.totalorder %s474_s26, %s470_s23 }
 0x117   : > { %p472_p7 = pnand %p471_p4, %p577_p5 }
 0x118   : > { %p477_p11 = por %p476_p10, %p475_p9 }
 0x119   : > { %p473_p8 = pneg %p472_p7 }
 0x11b   : > { %p478_p12 = pnand %p477_p11, %p473_p8 }
 0x11d   : > { %481 = shalt.err (!%p478_p12)
}
 0x11e   : > { %s523_s29 = smov 128  }
 0x11f   : > { %412 = dma.vmem_to_hbm [thread:$0]  (%p577_p5), %s624_s5, 256, %s629_s14, %s631_s13, %s523_s29, %s523_s29, %s519_s30  }
 0x120 PF: > { %p418_p13 = scmp.ge.s32.totalorder %s516_s12, 2  ;;  %s337_s3 = sand.u32 1, %s504_s9  }
 0x121   : > { %s338_s4 = scalar_lea.sflag [#allocation3], %s337_s3 }
 0x122   : > { %p415_p0 = pnand %p418_p13, %p581_p6 }
 0x124   : > { %p416_p1 = pneg %p415_p0 }
 0x126   : > { %499 = dma.done.wait (%p416_p1), %s338_s4, 256  }
 0x127   : > { %501 = vsyncadd (%p416_p1), %s338_s4, 4294967040  ;;  %p12_p2 = scmp.ge.s32.totalorder %s564_s15, 4   ;;  %s677_s9 = smov %s508_s10 }
 0x128   : > { %s678_s10 = smov %s512_s11  ;;  %s679_s11 = smov %s575_s18 }
 0x129   : > { %s680_s12 = smov %s564_s15  ;;  %14 = sbr.rel (!%p12_p2) target bundleno = 3 (0x3), region = 65 }
 0x12e   :  { %343 = vsyncpa [#allocation3], 1 }
 0x12f   :  { %345 = vsyncpa [#allocation3 + $0x1], 1 }

</bundles_post_ra>
